<compile_context>
chip_gen: v7x
topology: tpu7x:2x2x1
jax: 0.10.0
libtpu: 0.0.40
codegen_flags: <defaults>
</compile_context>

<pallas_src>
import functools
import math

import numpy as np
import jax
import jax.numpy as jnp
from jax import lax
from jax.experimental import pallas as pl
from jax.experimental.pallas import tpu as pltpu


# ----------------------------------------------------------------------------
# generation-aware VMEM budget / tile candidates
# ----------------------------------------------------------------------------
def _detect_vmem_capacity():
    try:
        info = pltpu.get_tpu_info()
        for attr in ("vmem_capacity_bytes", "vmem_bytes", "vmem_size_bytes"):
            v = getattr(info, attr, None)
            if v:
                return int(v)
    except Exception:
        pass
    return 64 * 1024 * 1024          # conservative default (v7x: 64 MiB / core)


_VMEM_CAP = _detect_vmem_capacity()
_BIG_VMEM = _VMEM_CAP >= (100 << 20)                  # v5e / v6e: 128 MiB per core
VMEM_LIMIT = int((96 << 20) if _BIG_VMEM else (48 << 20))
_VMEM_BUDGET = int(VMEM_LIMIT * 0.75)                 # headroom for pipeline buffers
_TM_CAND = (1024, 512, 256, 128) if _BIG_VMEM else (512, 256, 128)
_TN_CAND = (512, 256, 128) if _BIG_VMEM else (256, 128)
_TK_CAND = (1024, 512, 256, 128) if _BIG_VMEM else (512, 256, 128)


# ----------------------------------------------------------------------------
# sin-cos positional embedding (numpy, same as reference)
# ----------------------------------------------------------------------------
def get_1d_sincos_pos_embed_from_grid(embed_dim, pos):
    assert embed_dim % 2 == 0
    omega = np.arange(embed_dim // 2, dtype=np.float32)
    omega /= embed_dim / 2.0
    omega = 1.0 / 10000 ** omega
    pos = pos.reshape(-1)
    out = np.einsum('m,d->md', pos, omega)
    emb_sin = np.sin(out)
    emb_cos = np.cos(out)
    return np.concatenate([emb_sin, emb_cos], axis=1)


def get_2d_sincos_pos_embed_from_grid(embed_dim, grid):
    assert embed_dim % 2 == 0
    emb_h = get_1d_sincos_pos_embed_from_grid(embed_dim // 2, grid[0])
    emb_w = get_1d_sincos_pos_embed_from_grid(embed_dim // 2, grid[1])
    return np.concatenate([emb_h, emb_w], axis=1)


def get_2d_sincos_pos_embed(embed_dim, grid_size, cls_token=False):
    grid_h = np.arange(grid_size, dtype=np.float32)
    grid_w = np.arange(grid_size, dtype=np.float32)
    grid = np.meshgrid(grid_w, grid_h)
    grid = np.stack(grid, axis=0)
    grid = grid.reshape([2, 1, grid_size, grid_size])
    pos_embed = get_2d_sincos_pos_embed_from_grid(embed_dim, grid)
    if cls_token:
        pos_embed = np.concatenate([np.zeros([1, embed_dim]), pos_embed], axis=0)
    return pos_embed


# ----------------------------------------------------------------------------
# small shape helpers
# ----------------------------------------------------------------------------
def _round_up(x, m):
    return ((x + m - 1) // m) * m


def _pick_tile(dim, candidates):
    for c in candidates:
        if dim % c == 0:
            return c
    return dim


def _pad_to(x, shape):
    pads = [(0, t - s) for s, t in zip(x.shape, shape)]
    if all(p == (0, 0) for p in pads):
        return x
    return jnp.pad(x, pads)


# ----------------------------------------------------------------------------
# Pallas kernels
# ----------------------------------------------------------------------------
def _matmul_kernel(x_ref, w_ref, b_ref, o_ref):
    # K-accumulated matmul: accumulate directly in the resident f32 output
    # block; no zero-init store (bias folded into the k==0 write).
    k = pl.program_id(2)
    prod = jnp.dot(x_ref[...].astype(jnp.bfloat16),
                   w_ref[...].astype(jnp.bfloat16),
                   preferred_element_type=jnp.float32)

    @pl.when(k == 0)
    def _():
        o_ref[...] = prod + b_ref[...]

    @pl.when(k > 0)
    def _():
        o_ref[...] += prod


def _matmul_res_kernel(x_ref, w_ref, b_ref, r_ref, o_ref):
    # Same, with the residual fused into the k==0 write (writes x + W(x)+b).
    k = pl.program_id(2)
    prod = jnp.dot(x_ref[...].astype(jnp.bfloat16),
                   w_ref[...].astype(jnp.bfloat16),
                   preferred_element_type=jnp.float32)

    @pl.when(k == 0)
    def _():
        o_ref[...] = prod + b_ref[...] + r_ref[...]

    @pl.when(k > 0)
    def _():
        o_ref[...] += prod


def _ln_linear_kernel(x_ref, g_ref, bln_ref, w_ref, b_ref, o_ref, xn_ref, *, gelu):
    # NOTE: the xn_ref reuse is only correct because the N (j) axis is the
    # innermost, sequential ("arbitrary") grid axis, so j == 0 runs before any
    # j > 0 tile for every row tile i (per core).  Do not reorder the grid or
    # mark the j axis "parallel".
    @pl.when(pl.program_id(1) == 0)
    def _():
        x = x_ref[...]                                     # f32 [tm, D]
        mu = jnp.mean(x, axis=-1, keepdims=True)
        var = jnp.mean((x - mu) ** 2, axis=-1, keepdims=True)
        xn = ((x - mu) * lax.rsqrt(var + jnp.float32(1e-5))) \
            * g_ref[...] + bln_ref[...]
        xn_ref[...] = xn.astype(xn_ref.dtype)              # bf16 scratch

    y = jnp.dot(xn_ref[...], w_ref[...],
                preferred_element_type=jnp.float32) + b_ref[...]
    if gelu:
        # exact GELU (erf), matching torch.nn.GELU default
        y = 0.5 * y * (1.0 + lax.erf(y * jnp.float32(0.7071067811865476)))
    o_ref[...] = y.astype(o_ref.dtype)


def _layernorm_kernel(x_ref, g_ref, b_ref, o_ref):
    x = x_ref[...]
    mu = jnp.mean(x, axis=-1, keepdims=True)
    var = jnp.mean((x - mu) ** 2, axis=-1, keepdims=True)
    o_ref[...] = ((x - mu) * lax.rsqrt(var + jnp.float32(1e-5))) \
        * g_ref[...] + b_ref[...]


def _attn_proj_kernel(q_ref, k_ref, v_ref, w_ref, b_ref, r_ref, o_ref, *, scale):
    # grid = (batch_block, head); the [bb, S, D] output block stays resident
    # across the head ("arbitrary") axis and accumulates residual + bias +
    # sum_h softmax(q_h k_h^T * scale) v_h @ proj_w_h   (proj fused).
    h = pl.program_id(1)
    q = q_ref[...]                                         # [bb, S, dh] bf16
    k = k_ref[...]
    v = v_ref[...]
    s = jnp.einsum('bqd,bkd->bqk', q, k,
                   preferred_element_type=jnp.float32) * jnp.float32(scale)
    s = s - jnp.max(s, axis=-1, keepdims=True)
    p = jnp.exp(s)
    p = p / jnp.sum(p, axis=-1, keepdims=True)             # exact (no approx recip)
    o_h = jnp.einsum('bqk,bkd->bqd', p.astype(v.dtype), v,
                     preferred_element_type=jnp.float32)   # [bb, S, dh] f32
    contrib = jnp.einsum('bsd,de->bse', o_h.astype(w_ref.dtype), w_ref[...],
                         preferred_element_type=jnp.float32)  # [bb, S, D] f32

    @pl.when(h == 0)
    def _():
        o_ref[...] = r_ref[...] + b_ref[...] + contrib

    @pl.when(h > 0)
    def _():
        o_ref[...] += contrib


# ----------------------------------------------------------------------------
# Pallas wrappers
# ----------------------------------------------------------------------------
def pallas_linear(x2d, w, b, residual=None):
    """out = x @ w + b (+ residual), K-accumulated, bf16 MXU, f32 accumulate."""
    M, K = x2d.shape
    K2, N = w.shape
    assert K == K2
    Mp, Kp, Np = _round_up(M, 128), _round_up(K, 128), _round_up(N, 128)
    tm = _pick_tile(Mp, _TM_CAND)
    tn = _pick_tile(Np, _TN_CAND)
    tk = _pick_tile(Kp, _TK_CAND)

    xsz = x2d.dtype.itemsize
    rsz = 4 if residual is not None else 0

    def foot(tm_, tk_, tn_):
        return (2 * (tm_ * tk_ * xsz + tk_ * tn_ * 2 + tn_ * 4 + tm_ * tn_ * rsz)
                + 2 * tm_ * tn_ * 4)

    while foot(tm, tk, tn) > _VMEM_BUDGET and tk > 128:
        tk //= 2
    while foot(tm, tk, tn) > _VMEM_BUDGET and tm > 128:
        tm //= 2
    while foot(tm, tk, tn) > _VMEM_BUDGET and tn > 128:
        tn //= 2

    xp = _pad_to(x2d, (Mp, Kp))
    wp = _pad_to(w, (Kp, Np))
    bp = _pad_to(b.reshape(1, N).astype(jnp.float32), (1, Np))

    in_specs = [
        pl.BlockSpec((tm, tk), lambda i, j, k: (i, k)),
        pl.BlockSpec((tk, tn), lambda i, j, k: (k, j)),
        pl.BlockSpec((1, tn), lambda i, j, k: (0, j)),
    ]
    args = [xp, wp, bp]
    bytes_accessed = xsz * Mp * Kp + 2 * Kp * Np + 4 * Mp * Np + 4 * Np
    if residual is not None:
        rp = _pad_to(residual.astype(jnp.float32), (Mp, Np))
        in_specs.append(pl.BlockSpec((tm, tn), lambda i, j, k: (i, j)))
        args.append(rp)
        kern = _matmul_res_kernel
        bytes_accessed += 4 * Mp * Np
    else:
        kern = _matmul_kernel

    out = pl.pallas_call(
        kern,
        out_shape=jax.ShapeDtypeStruct((Mp, Np), jnp.float32),
        grid=(Mp // tm, Np // tn, Kp // tk),
        in_specs=in_specs,
        out_specs=pl.BlockSpec((tm, tn), lambda i, j, k: (i, j)),
        compiler_params=pltpu.CompilerParams(
            dimension_semantics=("parallel", "parallel", "arbitrary"),
            vmem_limit_bytes=VMEM_LIMIT),
        cost_estimate=pl.CostEstimate(
            flops=2 * Mp * Np * Kp,
            transcendentals=0,
            bytes_accessed=int(bytes_accessed)),
    )(*args)
    return out[:M, :N]


def pallas_ln_linear(x2d, gamma, beta, w, b, *, gelu=False, out_dtype=jnp.float32):
    """out = LayerNorm(x) @ w + b (optionally GELU), LN fused; K = full feature dim."""
    M, D = x2d.shape
    D2, N = w.shape
    assert D == D2
    Mp, Np = _round_up(M, 128), _round_up(N, 128)
    tm = _pick_tile(Mp, _TM_CAND)
    tn = _pick_tile(Np, _TN_CAND)
    osz = jnp.dtype(out_dtype).itemsize

    def foot(tm_, tn_):
        return (2 * (tm_ * D * 4 + D * tn_ * 2 + tn_ * 4 + 2 * D * 4)
                + 2 * tm_ * tn_ * osz + tm_ * D * 2)

    while foot(tm, tn) > _VMEM_BUDGET and tm > 128:
        tm //= 2
    while foot(tm, tn) > _VMEM_BUDGET and tn > 128:
        tn //= 2

    xp = _pad_to(x2d, (Mp, D))          # padded rows -> LN gives beta rows; sliced off
    wp = _pad_to(w, (D, Np))
    bp = _pad_to(b.reshape(1, N).astype(jnp.float32), (1, Np))

    out = pl.pallas_call(
        functools.partial(_ln_linear_kernel, gelu=gelu),
        out_shape=jax.ShapeDtypeStruct((Mp, Np), out_dtype),
        grid=(Mp // tm, Np // tn),
        in_specs=[
            pl.BlockSpec((tm, D), lambda i, j: (i, 0)),
            pl.BlockSpec((1, D), lambda i, j: (0, 0)),
            pl.BlockSpec((1, D), lambda i, j: (0, 0)),
            pl.BlockSpec((D, tn), lambda i, j: (0, j)),
            pl.BlockSpec((1, tn), lambda i, j: (0, j)),
        ],
        out_specs=pl.BlockSpec((tm, tn), lambda i, j: (i, j)),
        scratch_shapes=[pltpu.VMEM((tm, D), jnp.bfloat16)],   # normalized rows (bf16)
        compiler_params=pltpu.CompilerParams(
            dimension_semantics=("parallel", "arbitrary"),
            vmem_limit_bytes=VMEM_LIMIT),
        cost_estimate=pl.CostEstimate(
            flops=2 * Mp * Np * D + 8 * Mp * D,
            transcendentals=(Mp * Np if gelu else 0) + Mp,
            bytes_accessed=int(4 * Mp * D + 2 * D * Np + osz * Mp * Np + 8 * D)),
    )(xp, gamma.reshape(1, D).astype(jnp.float32),
      beta.reshape(1, D).astype(jnp.float32), wp, bp)
    return out[:M, :N]


def pallas_layernorm(x2d, gamma, beta):
    M, D = x2d.shape
    Mp = _round_up(M, 128)
    tm = _pick_tile(Mp, (512, 256, 128))
    xp = _pad_to(x2d, (Mp, D))
    out = pl.pallas_call(
        _layernorm_kernel,
        out_shape=jax.ShapeDtypeStruct((Mp, D), jnp.float32),
        grid=(Mp // tm,),
        in_specs=[
            pl.BlockSpec((tm, D), lambda i: (i, 0)),
            pl.BlockSpec((1, D), lambda i: (0, 0)),
            pl.BlockSpec((1, D), lambda i: (0, 0)),
        ],
        out_specs=pl.BlockSpec((tm, D), lambda i: (i, 0)),
        compiler_params=pltpu.CompilerParams(
            dimension_semantics=("parallel",),
            vmem_limit_bytes=VMEM_LIMIT),
        cost_estimate=pl.CostEstimate(
            flops=8 * Mp * D,
            transcendentals=Mp,
            bytes_accessed=4 * (2 * Mp * D + 2 * D)),
    )(xp, gamma.reshape(1, D).astype(jnp.float32),
      beta.reshape(1, D).astype(jnp.float32))
    return out[:M]


def pallas_attention_proj(q, k, v, proj_w_h, proj_b, x_res):
    """Fused multi-head attention + output projection + residual add.

    q, k, v:   [B, H, S, dh]  (bf16, head-major; lane-dense per-head tiles)
    proj_w_h:  [H, dh, D]     (bf16, per-head slices of the output projection)
    proj_b:    [D]            (f32)
    x_res:     [B, S, D]      (f32 residual stream)
    returns    [B, S, D]      (f32) = x_res + proj(attention(...)) + proj_b
    """
    B, H, S, dh = q.shape
    D = x_res.shape[-1]
    scale = 1.0 / math.sqrt(dh)
    bb = _pick_tile(B, (16, 8, 4, 2, 1))     # batch-blocked grid steps
    kern = functools.partial(_attn_proj_kernel, scale=scale)
    return pl.pallas_call(
        kern,
        out_shape=jax.ShapeDtypeStruct((B, S, D), jnp.float32),
        grid=(B // bb, H),
        in_specs=[
            pl.BlockSpec((bb, None, S, dh), lambda b, h: (b, h, 0, 0)),
            pl.BlockSpec((bb, None, S, dh), lambda b, h: (b, h, 0, 0)),
            pl.BlockSpec((bb, None, S, dh), lambda b, h: (b, h, 0, 0)),
            pl.BlockSpec((None, dh, D), lambda b, h: (h, 0, 0)),
            pl.BlockSpec((1, D), lambda b, h: (0, 0)),
            pl.BlockSpec((bb, S, D), lambda b, h: (b, 0, 0)),
        ],
        out_specs=pl.BlockSpec((bb, S, D), lambda b, h: (b, 0, 0)),
        compiler_params=pltpu.CompilerParams(
            dimension_semantics=("parallel", "arbitrary"),
            vmem_limit_bytes=VMEM_LIMIT),
        cost_estimate=pl.CostEstimate(
            flops=4 * B * H * S * S * dh + 2 * B * S * D * D,
            transcendentals=B * H * S * S,
            bytes_accessed=int(3 * 2 * B * H * S * dh + 2 * H * dh * D
                               + 4 * D + 2 * 4 * B * S * D)),
    )(q, k, v, proj_w_h, proj_b.reshape(1, D).astype(jnp.float32), x_res)


# ----------------------------------------------------------------------------
# Model glue (plain JAX)
# ----------------------------------------------------------------------------
def patchify(x, p):
    # x: [B, C, H, W]  (NCHW, matching PyTorch)
    B, C, H, W = x.shape
    hn, wn = H // p, W // p
    x = x.reshape(B, C, hn, p, wn, p)
    x = x.transpose(0, 2, 4, 1, 3, 5)          # [B, hn, wn, C, p, p]
    return x.reshape(B, hn * wn, C * p * p)    # flatten (c, ph, pw) like conv weight


def random_masking(x, mask_ratio, key):
    B, N, D = x.shape
    len_keep = int(N * (1 - mask_ratio))
    noise = jax.random.uniform(key, (B, N), dtype=jnp.float32)
    ids_shuffle = jnp.argsort(noise, axis=1)
    ids_restore = jnp.argsort(ids_shuffle, axis=1)
    ids_keep = ids_shuffle[:, :len_keep]
    x_masked = jnp.take_along_axis(x, ids_keep[:, :, None], axis=1)
    mask = jnp.ones((B, N), dtype=jnp.float32)
    mask = mask.at[:, :len_keep].set(0.0)
    mask = jnp.take_along_axis(mask, ids_restore, axis=1)
    return x_masked, mask, ids_restore


def block_forward(p, x, num_heads):
    B, S, D = x.shape
    M = B * S
    dh = D // num_heads
    x2 = x.reshape(M, D)                                    # f32 residual stream

    # --- attention: fused LN1+qkv (bf16 out) -> fused attn + out-proj + residual
    qkv = pallas_ln_linear(x2, p['ln1_g'], p['ln1_b'], p['qkv_w'], p['qkv_b'],
                           out_dtype=jnp.bfloat16)          # [M, 3D] bf16
    # head-major relayout stays in JAX (equivalent of the reference permute);
    # the kernel then receives lane-dense [bb, S, dh] tiles per (batch, head).
    qkv = qkv.reshape(B, S, 3, num_heads, dh).transpose(2, 0, 3, 1, 4)  # [3,B,H,S,dh]
    x = pallas_attention_proj(qkv[0], qkv[1], qkv[2],
                              p['proj_w'], p['proj_b'], x)  # [B, S, D] f32

    # --- mlp: fused LN2+fc1+GELU (bf16 out) -> fc2 + residual
    x2 = x.reshape(M, D)
    h1 = pallas_ln_linear(x2, p['ln2_g'], p['ln2_b'], p['fc1_w'], p['fc1_b'],
                          gelu=True, out_dtype=jnp.bfloat16)
    x2 = pallas_linear(h1, p['fc2_w'], p['fc2_b'], residual=x2)
    return x2.reshape(B, S, D)


def encoder_forward(params, x, mask_ratio, key, *, patch_size, num_heads):
    mask_ratio = float(mask_ratio)
    B = x.shape[0]
    D = params['pos_embed'].shape[-1]

    # patch embedding (conv k=s=patch  ==  patchify + matmul)
    patches = patchify(x, patch_size)                           # [B, Np, C*p*p]
    Np = patches.shape[1]
    tok = pallas_linear(
        patches.reshape(B * Np, -1), params['patch_w'], params['patch_b']
    ).reshape(B, Np, D)

    tok = tok + params['pos_embed'][:, 1:, :]
    # TODO(synk): random masking (argsort + gather) stays in plain JAX.
    x_masked, mask, ids_restore = random_masking(tok, mask_ratio, key)

    cls_token = params['cls_token'] + params['pos_embed'][:, :1, :]
    cls_tokens = jnp.broadcast_to(cls_token, (B, 1, D))
    h = jnp.concatenate([cls_tokens, x_masked], axis=1)         # [B, S, D]

    for blk in params['blocks']:
        h = block_forward(blk, h, num_heads)

    S = h.shape[1]
    h = pallas_layernorm(h.reshape(B * S, D), params['norm_g'], params['norm_b'])
    h = h.reshape(B, S, D)

    if mask_ratio > 0.0:
        return h, mask, ids_restore
    else:
        return h[:, 0, :]


# ----------------------------------------------------------------------------
# deterministic parameter init (synthetic; mirrors shapes in Encoder.__init__)
# weights stored in bf16 (MXU dtype); biases / LN params in f32
# ----------------------------------------------------------------------------
def init_params(key, *, img_size, patch_size, embed_dim, num_layer, num_heads,
                mlp_ratio):
    D = embed_dim
    dh = D // num_heads
    num_patches = (img_size // patch_size) ** 2
    hidden = int(D * mlp_ratio)
    keys = jax.random.split(key, 4 + num_layer)

    pos = get_2d_sincos_pos_embed(D, int(num_patches ** 0.5), cls_token=True)
    params = {
        'pos_embed': jnp.asarray(pos, jnp.float32)[None],                 # [1, Np+1, D]
        'cls_token': (0.02 * jax.random.truncated_normal(
            keys[0], -2.0, 2.0, (1, 1, D))).astype(jnp.float32),
        'norm_g': jnp.ones((D,), jnp.float32),
        'norm_b': jnp.zeros((D,), jnp.float32),
    }

    fan_in = 3 * patch_size * patch_size
    a = math.sqrt(6.0 / (fan_in + D))                                     # xavier_uniform
    w = jax.random.uniform(keys[1], (D, fan_in), minval=-a, maxval=a)
    params['patch_w'] = w.T.astype(jnp.bfloat16)                          # [C*p*p, D]
    bb = 1.0 / math.sqrt(fan_in)
    params['patch_b'] = jax.random.uniform(
        keys[2], (D,), minval=-bb, maxval=bb).astype(jnp.float32)

    def lin(k, fi, fo):
        lim = 1.0 / math.sqrt(fi)
        return jax.random.uniform(k, (fi, fo), minval=-lim, maxval=lim).astype(jnp.float32)

    blocks = []
    for i in range(num_layer):
        bk = jax.random.split(keys[4 + i], 4)
        proj_w = lin(bk[1], D, D).reshape(num_heads, dh, D)               # per-head slices
        blocks.append({
            'ln1_g': jnp.ones((D,), jnp.float32), 'ln1_b': jnp.zeros((D,), jnp.float32),
            'qkv_w': lin(bk[0], D, 3 * D).astype(jnp.bfloat16),
            'qkv_b': jnp.zeros((3 * D,), jnp.float32),
            'proj_w': proj_w.astype(jnp.bfloat16),                        # [H, dh, D]
            'proj_b': jnp.zeros((D,), jnp.float32),
            'ln2_g': jnp.ones((D,), jnp.float32), 'ln2_b': jnp.zeros((D,), jnp.float32),
            'fc1_w': lin(bk[2], D, hidden).astype(jnp.bfloat16),
            'fc1_b': jnp.zeros((hidden,), jnp.float32),
            'fc2_w': lin(bk[3], hidden, D).astype(jnp.bfloat16),
            'fc2_b': jnp.zeros((D,), jnp.float32),
        })
    params['blocks'] = blocks
    return params


# ----------------------------------------------------------------------------
if __name__ == "__main__":
    # small config consistent with the module: img=16, patch=4 -> 16 patches
    IMG, PATCH, DIM, LAYERS, HEADS, MLP = 16, 4, 32, 2, 4, 4.0
    MASK_RATIO = 0.75   # keep int(16 * 0.25) = 4 patches -> seq = 5 (with cls)

    key = jax.random.PRNGKey(0)
    k_x, k_p, k_mask = jax.random.split(key, 3)

    x = jax.random.normal(k_x, (2, 3, IMG, IMG), dtype=jnp.float32)   # NCHW
    params = init_params(k_p, img_size=IMG, patch_size=PATCH, embed_dim=DIM,
                         num_layer=LAYERS, num_heads=HEADS, mlp_ratio=MLP)

    out, mask, ids_restore = encoder_forward(
        params, x, MASK_RATIO, k_mask, patch_size=PATCH, num_heads=HEADS)

    jax.block_until_ready((out, mask, ids_restore))
    assert out.shape == (2, 1 + int(16 * (1 - MASK_RATIO)), DIM)
    assert mask.shape == (2, 16) and ids_restore.shape == (2, 16)
    assert bool(jnp.all(jnp.isfinite(out)))
    print("KERNEL_OK")
</pallas_src>

<mosaic_0001>
module attributes {stable_mosaic.version = 11 : i64} {
  func.func @_matmul_kernel(%arg0: i32, %arg1: i32, %arg2: i32, %arg3: memref<128x128xf32, #tpu.memory_space<vmem>>, %arg4: memref<128x128xbf16, #tpu.memory_space<vmem>>, %arg5: memref<1x128xf32, #tpu.memory_space<vmem>>, %arg6: memref<128x128xf32, #tpu.memory_space<vmem>>) attributes {dimension_semantics = [#tpu.dimension_semantics<parallel>, #tpu.dimension_semantics<parallel>, #tpu.dimension_semantics<arbitrary>], iteration_bounds = array<i64: 1, 1, 1>, scalar_prefetch = 0 : i64, scratch_operands = 0 : i64, tpu.core_type = #tpu.core_type<tc>, window_params = [{transform_indices = @transform_0, window_bounds = array<i64: 128, 128>}, {transform_indices = @transform_1, window_bounds = array<i64: 128, 128>}, {transform_indices = @transform_2, window_bounds = array<i64: 1, 128>}, {transform_indices = @transform_3, window_bounds = array<i64: 128, 128>}]} {
    %c0 = arith.constant 0 : index
    %c0_0 = arith.constant 0 : index
    %0 = vector.load %arg3[%c0, %c0_0] : memref<128x128xf32, #tpu.memory_space<vmem>>, vector<128x128xf32>
    %1 = arith.truncf %0 : vector<128x128xf32> to vector<128x128xbf16>
    %c0_1 = arith.constant 0 : index
    %c0_2 = arith.constant 0 : index
    %2 = vector.load %arg4[%c0_1, %c0_2] : memref<128x128xbf16, #tpu.memory_space<vmem>>, vector<128x128xbf16>
    %cst = arith.constant dense<0.000000e+00> : vector<128x128xf32>
    %3 = tpu.matmul %1, %2, %cst {dimension_numbers = #tpu.dot_dimension_numbers<[1], [0], [0], [1], [0, 0, 1, 1], [], []>} : vector<128x128xbf16>, vector<128x128xbf16>, vector<128x128xf32> -> vector<128x128xf32>
    %c0_i32 = arith.constant 0 : i32
    %4 = arith.cmpi eq, %arg2, %c0_i32 : i32
    %5 = arith.extui %4 : i1 to i32
    %c0_i32_3 = arith.constant 0 : i32
    %6 = arith.cmpi ne, %5, %c0_i32_3 : i32
    scf.if %6 {
      %c0_6 = arith.constant 0 : index
      %c0_7 = arith.constant 0 : index
      %10 = vector.load %arg5[%c0_6, %c0_7] : memref<1x128xf32, #tpu.memory_space<vmem>>, vector<1x128xf32>
      %11 = vector.broadcast %10 : vector<1x128xf32> to vector<128x128xf32>
      %12 = arith.addf %3, %11 : vector<128x128xf32>
      %c0_8 = arith.constant 0 : index
      %c0_9 = arith.constant 0 : index
      %13 = vector.load %arg6[%c0_8, %c0_9] : memref<128x128xf32, #tpu.memory_space<vmem>>, vector<128x128xf32>
      tpu.vector_store %arg6[%c0_8, %c0_9], %12 {strides = array<i32>} : memref<128x128xf32, #tpu.memory_space<vmem>>, vector<128x128xf32>,
    } else {
    }
    %c0_i32_4 = arith.constant 0 : i32
    %7 = arith.cmpi sgt, %arg2, %c0_i32_4 : i32
    %8 = arith.extui %7 : i1 to i32
    %c0_i32_5 = arith.constant 0 : i32
    %9 = arith.cmpi ne, %8, %c0_i32_5 : i32
    scf.if %9 {
      %c0_6 = arith.constant 0 : index
      %c0_7 = arith.constant 0 : index
      %10 = vector.load %arg6[%c0_6, %c0_7] : memref<128x128xf32, #tpu.memory_space<vmem>>, vector<128x128xf32>
      %11 = arith.addf %10, %3 : vector<128x128xf32>
      %c0_8 = arith.constant 0 : index
      %c0_9 = arith.constant 0 : index
      %12 = vector.load %arg6[%c0_8, %c0_9] : memref<128x128xf32, #tpu.memory_space<vmem>>, vector<128x128xf32>
      tpu.vector_store %arg6[%c0_8, %c0_9], %11 {strides = array<i32>} : memref<128x128xf32, #tpu.memory_space<vmem>>, vector<128x128xf32>,
    } else {
    }
    return
  }
  func.func @transform_0(%arg0: i32, %arg1: i32, %arg2: i32) -> (i32, i32) {
    %c0_i32 = arith.constant 0 : i32
    return %arg0, %arg2 : i32, i32
  }
  func.func @transform_1(%arg0: i32, %arg1: i32, %arg2: i32) -> (i32, i32) {
    %c0_i32 = arith.constant 0 : i32
    return %arg2, %arg1 : i32, i32
  }
  func.func @transform_2(%arg0: i32, %arg1: i32, %arg2: i32) -> (i32, i32) {
    %c0_i32 = arith.constant 0 : i32
    %c0_i32_0 = arith.constant 0 : i32
    return %c0_i32, %arg1 : i32, i32
  }
  func.func @transform_3(%arg0: i32, %arg1: i32, %arg2: i32) -> (i32, i32) {
    %c0_i32 = arith.constant 0 : i32
    return %arg0, %arg1 : i32, i32
  }
}

</mosaic_0001>

<bundles_post_ra>
// kernel: tpu_custom_call.1
= control target key start
LH: loop header
LB: loop body
LE: loop exit
PB: predicated region body
PF: predicated region fallthrough
CT: control target
= control target key end

     0   :  { %8 = vsyncpa [#allocation3], 0  ;;  %s574_s0 = inlined_call_operand.hbm [shape: f32[128,128], index: 0, kind: input, shape index: {}]   ;;  %s575_s1 = inlined_call_operand.hbm [shape: bf16[128,128], index: 1, kind: input, shape index: {}]   ;;  %s576_s2 = inlined_call_operand.vmem [shape: f32[1,128], index: 2, kind: input, shape index: {}]   ;;  %s577_s3 = inlined_call_operand.hbm [shape: f32[128,128], index: 3, kind: output, shape index: {}]  }
   0x1   :  { %9 = vsyncpa [#allocation6], 0 }
   0x2   :  { %10 = vsyncpa [#allocation4], 0  ;;  %s502_s12 = smov [#allocation2]   ;;  %s430_s16 = scalar_lea.hbm %s574_s0, 2048 }
   0x3   :  { %s16_s13 = sshll.u32 %s502_s12, 4  ;;  %p431_p0 = scmp.ne.s32.totalorder %s574_s0, %s430_s16  ;;  %s17_s13 = int_to_ptr.vmem [resolvable:$true] %s16_s13 }
   0x4   :  { %p434_p1 = scmp.lt.u32.totalorder %s430_s16, %s574_s0 }
   0x6   :  { %p436_p2 = pnand %p434_p1, %p431_p0 }
   0x8   :  { %439 = shalt.err (!%p436_p2)
}
   0x9   :  { %s440_s21 = scalar_lea.vmem %s17_s13, 2048  ;;  %p445_p4 = scmp.lt.s32.totalorder %s17_s13, %s17_s13 }
   0xa   :  { %p441_p3 = scmp.ne.s32.totalorder %s17_s13, %s440_s21  ;;  %p446_p5 = scmp.lt.s32.totalorder %s440_s21, %s440_s21 }
   0xc   :  { %p447_p6 = por %p446_p5, %p445_p4 }
   0xe   :  { %p448_p7 = pnand %p447_p6, %p441_p3 }
  0x10   :  { %451 = shalt.err (!%p448_p7)
}
  0x11   :  { %s503_s22 = smov 128   ;;  %s504_s23 = smov 8  }
  0x12   :  { %22 = dma.hbm_to_vmem [thread:$0]  %s574_s0, 2048, %s17_s13, [#allocation3], %s503_s22, %s503_s22, %s504_s23  }
  0x13   :  { %s505_s26 = smov [#allocation5]   ;;  %s452_s30 = scalar_lea.hbm %s575_s1, 1024 }
  0x14   :  { %s28_s27 = sshll.u32 %s505_s26, 4  ;;  %p453_p8 = scmp.ne.s32.totalorder %s575_s1, %s452_s30  ;;  %s29_s27 = int_to_ptr.vmem [resolvable:$true] %s28_s27 }
  0x15   :  { %p456_p9 = scmp.lt.u32.totalorder %s452_s30, %s575_s1 }
  0x17   :  { %p458_p10 = pnand %p456_p9, %p453_p8 }
  0x19   :  { %461 = shalt.err (!%p458_p10)
}
  0x1a   :  { %s462_s8 = scalar_lea.vmem %s29_s27, 1024  ;;  %p467_p12 = scmp.lt.s32.totalorder %s29_s27, %s29_s27 }
  0x1b   :  { %p463_p11 = scmp.ne.s32.totalorder %s29_s27, %s462_s8  ;;  %p468_p13 = scmp.lt.s32.totalorder %s462_s8, %s462_s8 }
  0x1d   :  { %p469_p0 = por %p468_p13, %p467_p12 }
  0x1f   :  { %p470_p1 = pnand %p469_p0, %p463_p11 }
  0x21   :  { %473 = shalt.err (!%p470_p1)
}
  0x22   :  { %s506_s0 = smov 64   ;;  %s507_s9 = smov 4  }
  0x23   :  { %34 = dma.hbm_to_vmem [thread:$0]  %s575_s1, 1024, %s29_s27, [#allocation6], %s506_s0, %s506_s0, %s507_s9  }
  0x24   :  { %496 = dma.done.wait [#allocation3], 2048  }
  0x25   :  { %497 = vsyncadd [#allocation3], 4294965248 }
  0x26   :  { %498 = dma.done.wait [#allocation6], 1024  }
  0x27   :  { %499 = vsyncadd [#allocation6], 4294966272  ;;  %v422_v0 = vld [vmem:[#allocation5] sm:$0xff]   ;;  %v423_v1 = vld [vmem:[#allocation5 + $0x8] sm:$0xff]  }
  0x28   :  { %367 = vmatprep.subr.bf16.mxu0 %v422_v0  ;;  %399 = vmatprep.subr.bf16.mxu1 %v422_v0  ;;  %v424_v2 = vld [vmem:[#allocation5 + $0x10] sm:$0xff]   ;;  %v425_v3 = vld [vmem:[#allocation5 + $0x18] sm:$0xff]   ;;  %v44_v4 = vld [vmem:[#allocation2] sm:$0xff] }
  0x29   :  { %368 = vmatpush3.bf16.msra.mxu0 %v422_v0  ;;  %407 = vmatpush3.bf16.msra.mxu1 %v422_v0  ;;  %v45_v5 = vld [vmem:[#allocation2 + $0x8] sm:$0xff]  ;;  %v52_v6 = vld [vmem:[#allocation2 + $0x40] sm:$0xff]  ;;  %v428_v12 = vld [vmem:[#allocation5 + $0x30] sm:$0xff]  }
  0x2a   :  { %369 = vmatprep.subr.bf16.mxu0 %v423_v1  ;;  %400 = vmatprep.subr.bf16.mxu1 %v423_v1  ;;  %v60_v7 = vpack.c.bf16 %v45_v5, %v44_v4  ;;  %v53_v8 = vld [vmem:[#allocation2 + $0x48] sm:$0xff]  ;;  %v426_v10 = vld [vmem:[#allocation5 + $0x20] sm:$0xff]   ;;  %v429_v13 = vld [vmem:[#allocation5 + $0x38] sm:$0xff]  }
  0x2b   :  { %v64_v9 = vpack.c.bf16 %v53_v8, %v52_v6  ;;  %v427_v11 = vld [vmem:[#allocation5 + $0x28] sm:$0xff]   ;;  %v46_v14 = vld [vmem:[#allocation2 + $0x10] sm:$0xff]  ;;  %v47_v15 = vld [vmem:[#allocation2 + $0x18] sm:$0xff] }
  0x2c   :  { %383 = vmatprep.mubr.bf16.mxu0 %v60_v7  ;;  %v54_v16 = vld [vmem:[#allocation2 + $0x50] sm:$0xff]  ;;  %v55_v17 = vld [vmem:[#allocation2 + $0x58] sm:$0xff]  ;;  %v48_v18 = vld [vmem:[#allocation2 + $0x20] sm:$0xff]  ;;  %v61_v22 = vpack.c.bf16 %v47_v15, %v46_v14 }
  0x2d   :  { %370 = vmatpush3.bf16.msra.mxu0 %v423_v1  ;;  %408 = vmatpush3.bf16.msra.mxu1 %v423_v1  ;;  %v49_v19 = vld [vmem:[#allocation2 + $0x28] sm:$0xff]  ;;  %v56_v20 = vld [vmem:[#allocation2 + $0x60] sm:$0xff]  ;;  %v65_v23 = vpack.c.bf16 %v55_v17, %v54_v16  ;;  %v50_v26 = vld [vmem:[#allocation2 + $0x30] sm:$0xff] }
  0x2e   :  { %371 = vmatprep.subr.bf16.mxu0 %v424_v2  ;;  %401 = vmatprep.subr.bf16.mxu1 %v424_v2  ;;  %v57_v21 = vld [vmem:[#allocation2 + $0x68] sm:$0xff]  ;;  %v62_v24 = vpack.c.bf16 %v49_v19, %v48_v18  ;;  %v51_v27 = vld [vmem:[#allocation2 + $0x38] sm:$0xff]  ;;  %v58_v28 = vld [vmem:[#allocation2 + $0x70] sm:$0xff] }
  0x2f   :  { %391 = vmatprep.mubr.bf16.mxu1 %v64_v9  ;;  %v66_v25 = vpack.c.bf16 %v57_v21, %v56_v20  ;;  %v59_v29 = vld [vmem:[#allocation2 + $0x78] sm:$0xff]  ;;  %v63_v30 = vpack.c.bf16 %v51_v27, %v50_v26  ;;  %v350_v32 = vld [vmem:[%s576_s2] ss:$0 sm:$0xff]  ;;  %s508_s2 = smov [#allocation7]  }
  0x30   :  { %v67_v31 = vpack.c.bf16 %v59_v29, %v58_v28  ;;  %s329_s13 = sshll.u32 %s508_s2, 4  ;;  %s330_s13 = int_to_ptr.vmem [resolvable:$true] %s329_s13 }
  0x31   :  { %372 = vmatpush3.bf16.msra.mxu0 %v424_v2  ;;  %409 = vmatpush3.bf16.msra.mxu1 %v424_v2  ;;  %s474_s14 = scalar_lea.vmem %s330_s13, 2048  ;;  %p479_p3 = scmp.lt.s32.totalorder %s330_s13, %s330_s13 }
  0x32   :  { %373 = vmatprep.subr.bf16.mxu0 %v425_v3  ;;  %402 = vmatprep.subr.bf16.mxu1 %v425_v3  ;;  %p475_p2 = scmp.ne.s32.totalorder %s330_s13, %s474_s14  ;;  %p480_p4 = scmp.lt.s32.totalorder %s474_s14, %s474_s14 }
  0x34   :  { %p481_p5 = por %p480_p4, %p479_p3 }
  0x35   :  { %374 = vmatpush3.bf16.msra.mxu0 %v425_v3  ;;  %410 = vmatpush3.bf16.msra.mxu1 %v425_v3 }
  0x36   :  { %375 = vmatprep.subr.bf16.mxu0 %v426_v10  ;;  %403 = vmatprep.subr.bf16.mxu1 %v426_v10  ;;  %p482_p6 = pnand %p481_p5, %p475_p2 }
  0x39   :  { %376 = vmatpush3.bf16.msra.mxu0 %v426_v10  ;;  %411 = vmatpush3.bf16.msra.mxu1 %v426_v10 }
  0x3a   :  { %377 = vmatprep.subr.bf16.mxu0 %v427_v11  ;;  %404 = vmatprep.subr.bf16.mxu1 %v427_v11 }
  0x3d   :  { %378 = vmatpush3.bf16.msra.mxu0 %v427_v11  ;;  %412 = vmatpush3.bf16.msra.mxu1 %v427_v11 }
  0x3e   :  { %379 = vmatprep.subr.bf16.mxu0 %v428_v12  ;;  %405 = vmatprep.subr.bf16.mxu1 %v428_v12 }
  0x41   :  { %380 = vmatpush3.bf16.msra.mxu0 %v428_v12  ;;  %413 = vmatpush3.bf16.msra.mxu1 %v428_v12 }
  0x42   :  { %381 = vmatprep.subr.bf16.mxu0 %v429_v13  ;;  %406 = vmatprep.subr.bf16.mxu1 %v429_v13 }
  0x45   :  { %382 = vmatpush3.bf16.msra.mxu0 %v429_v13  ;;  %414 = vmatpush3.bf16.msra.mxu1 %v429_v13 }
  0x48   :  { %384 = vmatmul.mubr.bf16.vlgmr.msra.gmra.mrb[0].mxu0 %v61_v22  ;;  %392 = vmatmul.mubr.bf16.vlgmr.msra.gmra.mrb[0].mxu1 %v65_v23 }
  0x49   :  { %387 = vmatprep.mubr.bf16.mxu0 %v62_v24  ;;  %395 = vmatprep.mubr.bf16.mxu1 %v66_v25 }
  0x50   :  { %388 = vmatmul.mubr.bf16.gmra.mrb[4].mxu0 %v63_v30  ;;  %396 = vmatmul.mubr.bf16.gmra.mrb[4].mxu1 %v67_v31 }
 0x11b   :  { %v385_v33 = vpop.f32.mrb[0].mxu0  ;;  %v393_v34 = vpop.f32.mrb[0].mxu1 }
 0x11c   :  { %v242_v35 = vadd.f32 %v385_v33, %v350_v32  ;;  %v250_v36 = vadd.f32 %v393_v34, %v350_v32  ;;  %v166_v37 = vpop.f32.mrb[1].mxu0  ;;  %v198_v38 = vpop.f32.mrb[1].mxu1 }
 0x11d   :  { %v240_v39 = vadd.f32 %v350_v32, %v166_v37  ;;  %v248_v40 = vadd.f32 %v350_v32, %v198_v38  ;;  %v386_v41 = vpop.f32.mrb[2].mxu0  ;;  %v394_v42 = vpop.f32.mrb[2].mxu1 }
 0x11e   :  { %258 = vst [vmem:[#allocation7 + $0x10] sm:$0xff] %v242_v35  ;;  %266 = vst [vmem:[#allocation7 + $0x50] sm:$0xff] %v250_v36  ;;  %v243_v43 = vadd.f32 %v386_v41, %v350_v32  ;;  %v251_v44 = vadd.f32 %v394_v42, %v350_v32  ;;  %v169_v45 = vpop.f32.mrb[3].mxu0  ;;  %v201_v46 = vpop.f32.mrb[3].mxu1 }
 0x11f   :  { %256 = vst [vmem:[#allocation7] sm:$0xff] %v240_v39  ;;  %264 = vst [vmem:[#allocation7 + $0x40] sm:$0xff] %v248_v40  ;;  %v241_v47 = vadd.f32 %v350_v32, %v169_v45  ;;  %v249_v48 = vadd.f32 %v350_v32, %v201_v46 }
 0x120   :  { %259 = vst [vmem:[#allocation7 + $0x18] sm:$0xff] %v243_v43  ;;  %267 = vst [vmem:[#allocation7 + $0x58] sm:$0xff] %v251_v44 }
 0x121   :  { %257 = vst [vmem:[#allocation7 + $0x8] sm:$0xff] %v241_v47  ;;  %265 = vst [vmem:[#allocation7 + $0x48] sm:$0xff] %v249_v48 }
 0x123   :  { %v389_v49 = vpop.f32.mrb[4].mxu0  ;;  %v397_v50 = vpop.f32.mrb[4].mxu1 }
 0x124   :  { %v246_v51 = vadd.f32 %v389_v49, %v350_v32  ;;  %v254_v52 = vadd.f32 %v397_v50, %v350_v32  ;;  %v182_v53 = vpop.f32.mrb[5].mxu0  ;;  %v214_v54 = vpop.f32.mrb[5].mxu1 }
 0x125   :  { %v244_v55 = vadd.f32 %v350_v32, %v182_v53  ;;  %v252_v56 = vadd.f32 %v350_v32, %v214_v54  ;;  %v390_v57 = vpop.f32.mrb[6].mxu0  ;;  %v398_v58 = vpop.f32.mrb[6].mxu1 }
 0x126   :  { %262 = vst [vmem:[#allocation7 + $0x30] sm:$0xff] %v246_v51  ;;  %270 = vst [vmem:[#allocation7 + $0x70] sm:$0xff] %v254_v52  ;;  %v247_v59 = vadd.f32 %v390_v57, %v350_v32  ;;  %v255_v60 = vadd.f32 %v398_v58, %v350_v32  ;;  %v185_v61 = vpop.f32.mrb[7].mxu0  ;;  %v217_v62 = vpop.f32.mrb[7].mxu1 }
 0x127   :  { %260 = vst [vmem:[#allocation7 + $0x20] sm:$0xff] %v244_v55  ;;  %268 = vst [vmem:[#allocation7 + $0x60] sm:$0xff] %v252_v56  ;;  %v245_v63 = vadd.f32 %v350_v32, %v185_v61  ;;  %v253_v0 = vadd.f32 %v350_v32, %v217_v62 }
 0x128   :  { %263 = vst [vmem:[#allocation7 + $0x38] sm:$0xff] %v247_v59  ;;  %271 = vst [vmem:[#allocation7 + $0x78] sm:$0xff] %v255_v60 }
 0x129   :  { %261 = vst [vmem:[#allocation7 + $0x28] sm:$0xff] %v245_v63  ;;  %269 = vst [vmem:[#allocation7 + $0x68] sm:$0xff] %v253_v0 }
 0x12a   :  { %485 = shalt.err (!%p482_p6)
}
 0x12b   :  { %s486_s17 = scalar_lea.hbm %s577_s3, 2048 }
 0x12c   :  { %p487_p7 = scmp.ne.s32.totalorder %s577_s3, %s486_s17  ;;  %p490_p8 = scmp.lt.u32.totalorder %s486_s17, %s577_s3 }
 0x12e   :  { %p492_p9 = pnand %p490_p8, %p487_p7 }
 0x130   :  { %495 = shalt.err (!%p492_p9)
}
 0x131   :  { %335 = dma.vmem_to_hbm [thread:$0]  %s330_s13, 2048, %s577_s3, [#allocation4], %s503_s22, %s503_s22, %s504_s23  }
 0x132   :  { %500 = dma.done.wait [#allocation4], 2048  }
 0x133   :  { %501 = vsyncadd [#allocation4], 4294965248 }
 0x134   :  { %339 = vsyncpa [#allocation3], 1 }
 0x135   :  { %340 = vsyncpa [#allocation6], 1 }
 0x136   :  { %341 = vsyncpa [#allocation4], 1 }

</bundles_post_ra>
